<compile_context>
chip_gen: v7x
topology: tpu7x:2x2x1
jax: 0.10.0
libtpu: 0.0.40
codegen_flags: <defaults>
</compile_context>

<pallas_src>
import functools
import math

import jax
import jax.numpy as jnp
from jax.experimental import pallas as pl
from jax.experimental.pallas import tpu as pltpu


# ----------------------------------------------------------------------------
# helpers
# ----------------------------------------------------------------------------

def _round_up(x, m):
    return ((x + m - 1) // m) * m


def _pick_tile(dim, target, align):
    """Largest tile <= target that divides `dim` and is a multiple of `align`;
    the full dim if dim <= target; full dim as last resort (rare)."""
    if dim <= target:
        return dim
    cand = (target // align) * align
    while cand >= align:
        if dim % cand == 0:
            return cand
        cand -= align
    # TODO(synk): truly awkward sizes would need a cdiv grid with masked edge
    # tiles; fall back to the full dimension (correct, possibly large).
    return dim


def _pad_head_cols(w_t, num_heads, head_dim, head_width):
    """[K, H*D] -> [K, H*W]: zero-pad each head's columns from D to W."""
    if head_width == head_dim:
        return w_t
    k = w_t.shape[0]
    w = w_t.reshape(k, num_heads, head_dim)
    w = jnp.pad(w, ((0, 0), (0, 0), (0, head_width - head_dim)))
    return w.reshape(k, num_heads * head_width)


def _pad_head_rows(w_t, num_heads, head_dim, head_width):
    """[H*D, N] -> [H*W, N]: zero-pad each head's rows from D to W."""
    if head_width == head_dim:
        return w_t
    n = w_t.shape[1]
    w = w_t.reshape(num_heads, head_dim, n)
    w = jnp.pad(w, ((0, 0), (0, head_width - head_dim), (0, 0)))
    return w.reshape(num_heads * head_width, n)


def _maybe_buffered(shape, index_map, n_steps, depth=3):
    """K/V BlockSpec with deeper pipelining on the serial KV axis."""
    if n_steps >= depth:
        try:
            return pl.BlockSpec(shape, index_map,
                                pipeline_mode=pl.Buffered(depth))
        except (TypeError, AttributeError):
            pass
    return pl.BlockSpec(shape, index_map)


# ----------------------------------------------------------------------------
# Tiled matmul:  out[M, N] = x[M, K] @ w_t[K, N]   (w_t already transposed)
# ----------------------------------------------------------------------------

def _matmul_kernel(x_ref, w_ref, o_ref, acc_ref):
    @pl.when(pl.program_id(2) == 0)
    def _init():
        acc_ref[...] = jnp.zeros_like(acc_ref)

    acc_ref[...] += jnp.dot(x_ref[...], w_ref[...],
                            preferred_element_type=jnp.float32)

    @pl.when(pl.program_id(2) == pl.num_programs(2) - 1)
    def _finalize():
        o_ref[...] = acc_ref[...].astype(o_ref.dtype)


def matmul(x, w_t, *, tm=512, tn=512, tk=512):
    M, K = x.shape
    K2, N = w_t.shape
    assert K == K2
    tm = _pick_tile(M, tm, 8)
    tn = _pick_tile(N, tn, 128)
    tk = _pick_tile(K, tk, 128)
    grid = (M // tm, N // tn, K // tk)
    itemsize = jnp.dtype(x.dtype).itemsize
    cost = pl.CostEstimate(
        flops=2 * M * N * K,
        transcendentals=0,
        bytes_accessed=(M * K + K * N + M * N) * itemsize,
    )
    # double-buffered x, w, out blocks + f32 accumulator (+ headroom)
    vmem_est = 2 * (tm * tk + tk * tn + tm * tn) * itemsize + tm * tn * 4
    vmem_limit = min(64 << 20, max(32 << 20, 2 * vmem_est))
    return pl.pallas_call(
        _matmul_kernel,
        out_shape=jax.ShapeDtypeStruct((M, N), x.dtype),
        grid=grid,
        in_specs=[
            pl.BlockSpec((tm, tk), lambda i, j, k: (i, k)),
            pl.BlockSpec((tk, tn), lambda i, j, k: (k, j)),
        ],
        out_specs=pl.BlockSpec((tm, tn), lambda i, j, k: (i, j)),
        scratch_shapes=[pltpu.VMEM((tm, tn), jnp.float32)],
        compiler_params=pltpu.CompilerParams(
            dimension_semantics=("parallel", "parallel", "arbitrary"),
            vmem_limit_bytes=vmem_limit),
        cost_estimate=cost,
    )(x, w_t)


# ----------------------------------------------------------------------------
# Flash attention (online softmax, one head per grid step, lane-dense blocks)
# ----------------------------------------------------------------------------

def _flash_kernel(q_ref, k_ref, v_ref, o_ref, m_ref, l_ref, acc_ref,
                  *, exp_dtype):
    kv_idx = pl.program_id(3)

    @pl.when(kv_idx == 0)
    def _init():
        m_ref[...] = jnp.full_like(m_ref, -jnp.inf)
        l_ref[...] = jnp.zeros_like(l_ref)
        acc_ref[...] = jnp.zeros_like(acc_ref)

    q = q_ref[0]          # (tq, W) -- Q already scaled by 1/sqrt(head_dim)
    k = k_ref[0]          # (tk, W)
    v = v_ref[0]          # (tk, W)

    # q @ k^T via dot_general contracting both last dims (no explicit .T).
    s = jax.lax.dot_general(q, k, (((1,), (1,)), ((), ())),
                            preferred_element_type=jnp.float32)   # (tq, tk)
    m_prev = m_ref[...]                                           # (tq, 1)
    m_new = jnp.maximum(m_prev, jnp.max(s, axis=-1, keepdims=True))
    alpha = jnp.exp(m_prev - m_new)                               # (tq, 1)
    if exp_dtype == jnp.float32:
        p = jnp.exp(s - m_new)                                    # (tq, tk)
        l_inc = jnp.sum(p, axis=-1, keepdims=True)
    else:
        # bf16 EUP path (v6e/v7x); denominator still accumulated in f32.
        p = jnp.exp((s - m_new).astype(exp_dtype))
        l_inc = jnp.sum(p.astype(jnp.float32), axis=-1, keepdims=True)
    l_ref[...] = alpha * l_ref[...] + l_inc
    acc_ref[...] = alpha * acc_ref[...] + jnp.dot(
        p.astype(v.dtype), v, preferred_element_type=jnp.float32)
    m_ref[...] = m_new

    @pl.when(kv_idx == pl.num_programs(3) - 1)
    def _finalize():
        inv_l = pl.reciprocal(l_ref[...], approx=True)            # EUP slot
        o_ref[0] = (acc_ref[...] * inv_l).astype(o_ref.dtype)


def flash_mha(q_arr, k_arr, v_arr, *, q_hoff, k_hoff, v_hoff,
              num_heads, head_width, tq=256, tk=128,
              exp_dtype=jnp.float32):
    """q/k/v_arr: [B, S, *] activations with (width-padded) heads packed along
    the last dim; *_hoff = head offset (in head_width units) of q/k/v inside
    that packed last dim.  Returns [B, Sq, num_heads*head_width]."""
    B, Sq, _ = q_arr.shape
    _, Skv, _ = k_arr.shape
    H, W = num_heads, head_width
    tq = _pick_tile(Sq, tq, 8)
    tk = _pick_tile(Skv, tk, 8)
    n_kv = Skv // tk
    grid = (B, H, Sq // tq, n_kv)

    def q_map(b, h, i, j, off=q_hoff):
        return (b, i, h + off)

    def k_map(b, h, i, j, off=k_hoff):
        return (b, j, h + off)

    def v_map(b, h, i, j, off=v_hoff):
        return (b, j, h + off)

    def o_map(b, h, i, j):
        return (b, i, h)

    itemsize = jnp.dtype(q_arr.dtype).itemsize
    cost = pl.CostEstimate(
        flops=4 * B * H * Sq * Skv * W,
        transcendentals=B * H * Sq * Skv,
        bytes_accessed=(2 * B * Sq * H * W + 2 * B * Skv * H * W) * itemsize,
    )
    kernel = functools.partial(_flash_kernel, exp_dtype=exp_dtype)
    return pl.pallas_call(
        kernel,
        out_shape=jax.ShapeDtypeStruct((B, Sq, H * W), q_arr.dtype),
        grid=grid,
        in_specs=[
            pl.BlockSpec((1, tq, W), q_map),
            _maybe_buffered((1, tk, W), k_map, n_kv),
            _maybe_buffered((1, tk, W), v_map, n_kv),
        ],
        out_specs=pl.BlockSpec((1, tq, W), o_map),
        scratch_shapes=[
            pltpu.VMEM((tq, 1), jnp.float32),    # running max
            pltpu.VMEM((tq, 1), jnp.float32),    # running denom
            pltpu.VMEM((tq, W), jnp.float32),    # output accumulator
        ],
        compiler_params=pltpu.CompilerParams(
            dimension_semantics=("parallel", "parallel", "parallel",
                                 "arbitrary")),
        cost_estimate=cost,
    )(q_arr, k_arr, v_arr)


# ----------------------------------------------------------------------------
# Attention module (forward pass only)
# ----------------------------------------------------------------------------

class Attention:
    def __init__(self, q_dim, num_heads, head_dim, kv_dim=None, key=None,
                 compute_dtype=None, softmax_exp_dtype=jnp.float32):
        dim_inner = head_dim * num_heads
        kv_dim = kv_dim if kv_dim is not None else q_dim
        self.q_dim = q_dim
        self.kv_dim = kv_dim
        self.num_heads = num_heads
        self.head_dim = head_dim
        self.dim_inner = dim_inner
        # Each head's projection columns are padded to a multiple of 128 so
        # every flash block is lane-aligned (free when head_dim % 128 == 0).
        self.head_width = _round_up(head_dim, 128)
        self.compute_dtype = compute_dtype            # e.g. jnp.bfloat16
        self.softmax_exp_dtype = softmax_exp_dtype    # bf16 OK on v6e/v7x

        if key is None:
            key = jax.random.PRNGKey(0)
        k1, k2, k3, k4 = jax.random.split(key, 4)
        # torch Linear layout [out_features, in_features] (kept for reference)
        self.w_q = 0.1 * jax.random.normal(k1, (dim_inner, q_dim), jnp.float32)
        self.w_k = 0.1 * jax.random.normal(k2, (dim_inner, kv_dim), jnp.float32)
        self.w_v = 0.1 * jax.random.normal(k3, (dim_inner, kv_dim), jnp.float32)
        self.w_out = 0.1 * jax.random.normal(k4, (q_dim, dim_inner), jnp.float32)

        # Kernel-side weights: pre-transposed to [in, out], attention scale
        # folded into the Q projection, per-head columns padded to head_width,
        # QKV fused when Q and KV share the same input.
        wdt = compute_dtype if compute_dtype is not None else jnp.float32
        H, D, W = num_heads, head_dim, self.head_width
        scale = 1.0 / math.sqrt(head_dim)
        w_q_t = _pad_head_cols((self.w_q * scale).T, H, D, W).astype(wdt)
        w_k_t = _pad_head_cols(self.w_k.T, H, D, W).astype(wdt)
        w_v_t = _pad_head_cols(self.w_v.T, H, D, W).astype(wdt)
        self.w_q_t = w_q_t                                        # [q_dim, H*W]
        self.w_kv_t = jnp.concatenate([w_k_t, w_v_t], axis=1)     # [kv_dim, 2HW]
        self.w_qkv_t = (jnp.concatenate([w_q_t, w_k_t, w_v_t], axis=1)
                        if kv_dim == q_dim else None)             # [q_dim, 3HW]
        # Padded rows are zero, so the pad columns of the attention output
        # contribute nothing to the final projection.
        self.w_out_t = _pad_head_rows(self.w_out.T, H, D, W).astype(wdt)
        # TODO(synk): use_IP_Adapter branch and attn_mask are not implemented
        # (module defaults exercise the mask-less, non-IP path).

    def __call__(self, hidden_states, encoder_hidden_states=None):
        in_dtype = hidden_states.dtype
        x = hidden_states
        if self.compute_dtype is not None:
            x = x.astype(self.compute_dtype)
        B, Sq, _ = x.shape
        H, W = self.num_heads, self.head_width
        Np = H * W

        if encoder_hidden_states is None and self.w_qkv_t is not None:
            # Self-attention: fused QKV projection (x read from HBM once);
            # heads are indexed straight out of the packed activation.
            qkv = matmul(x.reshape(B * Sq, self.q_dim),
                         self.w_qkv_t).reshape(B, Sq, 3 * Np)
            q_arr = k_arr = v_arr = qkv
            q_hoff, k_hoff, v_hoff = 0, H, 2 * H
        else:
            enc = x if encoder_hidden_states is None else encoder_hidden_states
            if self.compute_dtype is not None:
                enc = enc.astype(self.compute_dtype)
            Skv = enc.shape[1]
            q_arr = matmul(x.reshape(B * Sq, self.q_dim),
                           self.w_q_t).reshape(B, Sq, Np)
            kv = matmul(enc.reshape(B * Skv, self.kv_dim),
                        self.w_kv_t).reshape(B, Skv, 2 * Np)
            k_arr = v_arr = kv
            q_hoff, k_hoff, v_hoff = 0, 0, H

        # Flash attention; output already in merged-head [B, Sq, H*W] layout.
        o = flash_mha(q_arr, k_arr, v_arr,
                      q_hoff=q_hoff, k_hoff=k_hoff, v_hoff=v_hoff,
                      num_heads=H, head_width=W,
                      exp_dtype=self.softmax_exp_dtype)

        out = matmul(o.reshape(B * Sq, Np), self.w_out_t)
        return out.reshape(B, Sq, self.q_dim).astype(in_dtype)


# ----------------------------------------------------------------------------
# reference (pure JAX) for sanity
# ----------------------------------------------------------------------------

def reference(attn, x):
    B, S, _ = x.shape
    H, D = attn.num_heads, attn.head_dim
    q = x @ attn.w_q.T
    k = x @ attn.w_k.T
    v = x @ attn.w_v.T
    q = q.reshape(B, S, H, D).transpose(0, 2, 1, 3)
    k = k.reshape(B, S, H, D).transpose(0, 2, 1, 3)
    v = v.reshape(B, S, H, D).transpose(0, 2, 1, 3)
    s = jnp.einsum("bhqd,bhkd->bhqk", q, k) / jnp.sqrt(jnp.float32(D))
    p = jax.nn.softmax(s, axis=-1)
    o = jnp.einsum("bhqk,bhkd->bhqd", p, v)
    o = o.transpose(0, 2, 1, 3).reshape(B, S, H * D)
    return o @ attn.w_out.T


if __name__ == "__main__":
    key = jax.random.PRNGKey(0)
    kx, kp, kx2, kp2 = jax.random.split(key, 4)

    # --- test 1: small shapes (padded-head fallback path, single KV tile) ---
    B, S, q_dim = 2, 8, 32
    num_heads, head_dim = 4, 8
    x = jax.random.normal(kx, (B, S, q_dim), jnp.float32)
    attn = Attention(q_dim, num_heads, head_dim, key=kp)
    out = jax.block_until_ready(attn(x))
    ref = reference(attn, x)
    assert out.shape == (B, S, q_dim)
    # approx reciprocal (EUP) in the softmax finalize -> slightly looser tol.
    assert jnp.allclose(out, ref, atol=5e-3, rtol=5e-3), \
        float(jnp.max(jnp.abs(out - ref)))

    # --- test 2: multi-tile path (head_dim=128, multiple Q and KV tiles,
    #     exercises the online-softmax accumulation and buffered K/V) ---
    B2, S2, q_dim2 = 1, 512, 128
    num_heads2, head_dim2 = 2, 128
    x2 = jax.random.normal(kx2, (B2, S2, q_dim2), jnp.float32)
    attn2 = Attention(q_dim2, num_heads2, head_dim2, key=kp2)
    out2 = jax.block_until_ready(attn2(x2))
    ref2 = reference(attn2, x2)
    assert out2.shape == (B2, S2, q_dim2)
    assert jnp.allclose(out2, ref2, atol=1e-2, rtol=1e-2), \
        float(jnp.max(jnp.abs(out2 - ref2)))

    print("KERNEL_OK")
</pallas_src>

<mosaic_0001>
module attributes {stable_mosaic.version = 11 : i64} {
  func.func @_matmul_kernel(%arg0: i32, %arg1: i32, %arg2: i32, %arg3: memref<16x32xf32, #tpu.memory_space<vmem>>, %arg4: memref<32x512xf32, #tpu.memory_space<vmem>>, %arg5: memref<16x512xf32, #tpu.memory_space<vmem>>, %arg6: memref<16x512xf32, #tpu.memory_space<vmem>>) attributes {dimension_semantics = [#tpu.dimension_semantics<parallel>, #tpu.dimension_semantics<parallel>, #tpu.dimension_semantics<arbitrary>], iteration_bounds = array<i64: 1, 3, 1>, scalar_prefetch = 0 : i64, scratch_operands = 1 : i64, tpu.core_type = #tpu.core_type<tc>, window_params = [{transform_indices = @transform_0, window_bounds = array<i64: 16, 32>}, {transform_indices = @transform_1, window_bounds = array<i64: 32, 512>}, {transform_indices = @transform_2, window_bounds = array<i64: 16, 512>}]} {
    %c0_i32 = arith.constant 0 : i32
    %0 = arith.cmpi eq, %arg2, %c0_i32 : i32
    %1 = arith.extui %0 : i1 to i32
    %c0_i32_0 = arith.constant 0 : i32
    %2 = arith.cmpi ne, %1, %c0_i32_0 : i32
    scf.if %2 {
      %cst_10 = arith.constant 0.000000e+00 : f32
      %12 = vector.broadcast %cst_10 : f32 to vector<16x512xf32>
      %c0_11 = arith.constant 0 : index
      %c0_12 = arith.constant 0 : index
      %13 = vector.load %arg6[%c0_11, %c0_12] : memref<16x512xf32, #tpu.memory_space<vmem>>, vector<16x512xf32>
      tpu.vector_store %arg6[%c0_11, %c0_12], %12 {strides = array<i32>} : memref<16x512xf32, #tpu.memory_space<vmem>>, vector<16x512xf32>,
    } else {
    }
    %c0 = arith.constant 0 : index
    %c0_1 = arith.constant 0 : index
    %3 = vector.load %arg6[%c0, %c0_1] : memref<16x512xf32, #tpu.memory_space<vmem>>, vector<16x512xf32>
    %c0_2 = arith.constant 0 : index
    %c0_3 = arith.constant 0 : index
    %4 = vector.load %arg3[%c0_2, %c0_3] : memref<16x32xf32, #tpu.memory_space<vmem>>, vector<16x32xf32>
    %c0_4 = arith.constant 0 : index
    %c0_5 = arith.constant 0 : index
    %5 = vector.load %arg4[%c0_4, %c0_5] : memref<32x512xf32, #tpu.memory_space<vmem>>, vector<32x512xf32>
    %cst = arith.constant dense<0.000000e+00> : vector<16x512xf32>
    %6 = tpu.matmul %4, %5, %cst {dimension_numbers = #tpu.dot_dimension_numbers<[1], [0], [0], [1], [0, 0, 1, 1], [], []>} : vector<16x32xf32>, vector<32x512xf32>, vector<16x512xf32> -> vector<16x512xf32>
    %7 = arith.addf %3, %6 : vector<16x512xf32>
    %c0_6 = arith.constant 0 : index
    %c0_7 = arith.constant 0 : index
    %8 = vector.load %arg6[%c0_6, %c0_7] : memref<16x512xf32, #tpu.memory_space<vmem>>, vector<16x512xf32>
    tpu.vector_store %arg6[%c0_6, %c0_7], %7 {strides = array<i32>} : memref<16x512xf32, #tpu.memory_space<vmem>>, vector<16x512xf32>,
    %c0_i32_8 = arith.constant 0 : i32
    %9 = arith.cmpi eq, %arg2, %c0_i32_8 : i32
    %10 = arith.extui %9 : i1 to i32
    %c0_i32_9 = arith.constant 0 : i32
    %11 = arith.cmpi ne, %10, %c0_i32_9 : i32
    scf.if %11 {
      %c0_10 = arith.constant 0 : index
      %c0_11 = arith.constant 0 : index
      %12 = vector.load %arg6[%c0_10, %c0_11] : memref<16x512xf32, #tpu.memory_space<vmem>>, vector<16x512xf32>
      %c0_12 = arith.constant 0 : index
      %c0_13 = arith.constant 0 : index
      %13 = vector.load %arg5[%c0_12, %c0_13] : memref<16x512xf32, #tpu.memory_space<vmem>>, vector<16x512xf32>
      tpu.vector_store %arg5[%c0_12, %c0_13], %12 {strides = array<i32>} : memref<16x512xf32, #tpu.memory_space<vmem>>, vector<16x512xf32>,
    } else {
    }
    return
  }
  func.func @transform_0(%arg0: i32, %arg1: i32, %arg2: i32) -> (i32, i32) {
    %c0_i32 = arith.constant 0 : i32
    return %arg0, %arg2 : i32, i32
  }
  func.func @transform_1(%arg0: i32, %arg1: i32, %arg2: i32) -> (i32, i32) {
    %c0_i32 = arith.constant 0 : i32
    return %arg2, %arg1 : i32, i32
  }
  func.func @transform_2(%arg0: i32, %arg1: i32, %arg2: i32) -> (i32, i32) {
    %c0_i32 = arith.constant 0 : i32
    return %arg0, %arg1 : i32, i32
  }
}

</mosaic_0001>

<bundles_post_ra>
// kernel: tpu_custom_call.1
= control target key start
LH: loop header
LB: loop body
LE: loop exit
PB: predicated region body
PF: predicated region fallthrough
CT: control target
= control target key end

     0   :  { %7 = vsyncpa [#allocation4], 0  ;;  %s1100_s0 = inlined_call_operand.hbm [shape: f32[16,32], index: 0, kind: input, shape index: {}]   ;;  %s1101_s1 = inlined_call_operand.hbm [shape: f32[32,1536], index: 1, kind: input, shape index: {}]   ;;  %s1102_s2 = inlined_call_operand.hbm [shape: f32[16,1536], index: 2, kind: output, shape index: {}]  }
   0x1   :  { %8 = vsyncpa [#allocation7], 0 }
   0x2   :  { %10 = vsyncpa [#allocation7 + $0x1], 0 }
   0x3   :  { %11 = vsyncpa [#allocation5], 0 }
   0x4   :  { %13 = vsyncpa [#allocation5 + $0x1], 0  ;;  %s870_s9 = smov 0   ;;  %s872_s10 = smov 0  }
   0x5   :  { %s874_s11 = smov 0   ;;  %s876_s12 = smov 0  }
   0x6   :  { %s878_s13 = smov 0   ;;  %s880_s14 = smov 0  }
   0x7 LB: > { %s576_s15 = sadd.s32 4294967295, %s841_s14   ;;  %s577_s16 = sadd.s32 4294967294, %s841_s14   ;;  %s841_s14 = sphi %s880_s14, %s19_s14   ;;  %s837_s13 = sphi %s878_s13, %s1127_s13   ;;  %s833_s12 = sphi %s876_s12, %s1126_s12   ;;  %s829_s11 = sphi %s874_s11, %s1125_s11   ;;  %s825_s10 = sphi %s872_s10, %s1124_s10   ;;  %s821_s9 = sphi %s870_s9, %s1123_s9  }
   0x8   : > { %p82_p0 = scmp.ne.s32.totalorder %s829_s11, %s825_s10  ;;  %p83_p1 = scmp.eq.s32.totalorder %s841_s14, 0 }
   0x9   : > { %p88_p2 = scmp.ne.s32.totalorder %s825_s10, %s821_s9  ;;  %p907_p3 = scmp.eq.s32.totalorder %s576_s15, 0 }
   0xa   : > { %p911_p4 = por %p83_p1, %p82_p0  ;;  %p114_p5 = scmp.eq.s32.totalorder %s576_s15, 2 }
   0xb   : > { %s1109_s17 = scalar_select %p907_p3, 1, 0 }
   0xc   : > { %p917_p6 = por %p907_p3, %p88_p2  ;;  %p120_p7 = scmp.eq.s32.totalorder %s577_s16, 2 }
   0xd   : > { %p921_p8 = por %p114_p5, %p82_p0  ;;  %p578_p9 = scmp.ge.s32.totalorder %s841_s14, 1 }
   0xe   : > { %s1111_s19 = scalar_select %p917_p6, 1, 0 }
   0xf   : > { %s1112_s20 = scalar_select %p921_p8, 1, 0 }
  0x10   : > { %p926_p10 = por %p120_p7, %p88_p2  ;;  %p127_p11 = scmp.lt.s32.totalorder %s841_s14, 4 }
  0x11   : > { %s843_s23 = smov [#allocation3]   ;;  %p636_p0 = scmp.lt.s32.totalorder %s841_s14, 3 }
  0x12   : > { %s1113_s21 = scalar_select %p926_p10, 1, 0 }
  0x13   : > { %p931_p12 = pnand %p578_p9, %p127_p11  ;;  %s143_s24 = sshll.u32 %s843_s23, 4  ;;  %s144_s24 = int_to_ptr.vmem [resolvable:$true] %s143_s24 }
  0x14   : > { %p946_p2 = pnand %p636_p0, %p911_p4  ;;  %s34_s27 = sadd.s32 1, %s837_s13 }
  0x15   : > { %s1114_s22 = scalar_select %p931_p12, 1, 0 }
  0x16   : > { %p623_p13 = pneg %p931_p12  ;;  %s697_s30 = scalar_lea.hbm %s1100_s0, 256 }
  0x17   : > { %s1116_s26 = scalar_select %p946_p2, 1, 0 }
  0x18   : > { %p940_p1 = pnand %p623_p13, %p907_p3  ;;  %p698_p5 = scmp.ne.s32.totalorder %s1100_s0, %s697_s30 }
  0x19   : > { %p704_p4 = scmp.lt.u32.totalorder %s697_s30, %s1100_s0 }
  0x1a   : > { %p699_p7 = pneg %p940_p1 }
  0x1c   : > { %p700_p9 = pnand %p699_p7, %p698_p5 }
  0x1e   : > { %p701_p11 = pneg %p700_p9 }
  0x20   : > { %p706_p13 = pnand %p704_p4, %p701_p11 }
  0x22   : > { %709 = shalt.err (!%p706_p13)
}
  0x23   : > { %s710_s7 = scalar_lea.vmem %s144_s24, 256  ;;  %p718_p6 = scmp.lt.s32.totalorder %s144_s24, %s144_s24 }
  0x24   : > { %p711_p0 = scmp.ne.s32.totalorder %s144_s24, %s710_s7  ;;  %p719_p3 = scmp.lt.s32.totalorder %s710_s7, %s710_s7 }
  0x26   : > { %p713_p10 = pnand %p711_p0, %p699_p7  ;;  %p720_p12 = por %p719_p3, %p718_p6 }
  0x28   : > { %p714_p8 = pneg %p713_p10 }
  0x2a   : > { %p721_p2 = pnand %p720_p12, %p714_p8 }
  0x2c   : > { %724 = shalt.err (!%p721_p2)
}
  0x2d   : > { %s844_s8 = smov 128   ;;  %s845_s15 = smov 8  }
  0x2e   : > { %626 = dma.hbm_to_vmem [thread:$0]  (!%p940_p1), %s1100_s0, 256, %s144_s24, [#allocation4], %s844_s8, %s844_s8, %s845_s15  }
  0x2f   : > { %p36_p5 = scmp.ge.s32.totalorder %s34_s27, 3  ;;  %s75_s23 = sadd.s32 1, %s829_s11 }
  0x30   : > { %s157_s28 = sand.u32 1, %s829_s11   ;;  %s597_s3 = sshll.u32 %s837_s13, 9 }
  0x31   : > { %s1129_s27 = smov (%p36_p5, %s34_s27), 0  ;;  %s581_s29 = sshll.u32 %s157_s28, 7 }
  0x32   : > { %s71_s30 = ssub.s32 %s837_s13, %s1129_s27  ;;  %s977_s25 = scalar_lea.hbm %s1101_s1, %s597_s3 }
  0x33   : > { %p73_p3 = scmp.eq.s32.totalorder %s71_s30, 0  ;;  %s161_s24 = scalar_lea.vmem [#allocation6], %s581_s29 }
  0x34   : > { %s171_s6 = sshll.u32 %s161_s24, 4  ;;  %s984_s8 = scalar_lea.sflag [#allocation7], %s157_s28  ;;  %s982_s6 = int_to_ptr.vmem [resolvable:$true] %s171_s6 }
  0x35   : > { %s980_s7 = scalar_select %p73_p3, %s829_s11, %s75_s23  }
  0x36   : > { %s725_s15 = scalar_lea.hbm %s977_s25, 2048  ;;  %p1117_p8 = scmp.ne.s32.totalorder %s1116_s26, 0 }
  0x37   : > { %p726_p6 = scmp.ne.s32.totalorder %s977_s25, %s725_s15  ;;  %s730_s30 = scalar_lea.hbm %s1101_s1, 6144 }
  0x38   : > { %p727_p10 = pneg %p1117_p8  ;;  %p731_p2 = scmp.lt.u32.totalorder %s977_s25, %s1101_s1 }
  0x39   : > { %p732_p7 = scmp.lt.u32.totalorder %s730_s30, %s725_s15  ;;  %p734_p11 = scmp.lt.u32.totalorder %s725_s15, %s977_s25 }
  0x3a   : > { %p728_p12 = pnand %p727_p10, %p726_p6 }
  0x3b   : > { %p733_p9 = por %p732_p7, %p731_p2 }
  0x3c   : > { %p729_p1 = pneg %p728_p12 }
  0x3d   : > { %p735_p4 = por %p734_p11, %p733_p9 }
  0x3f   : > { %p736_p13 = pnand %p735_p4, %p729_p1 }
  0x41   : > { %739 = shalt.err (!%p736_p13)
}
  0x42   : > { %s740_s23 = scalar_lea.vmem %s982_s6, 2048  ;;  %s846_s28 = smov [#allocation6]  }
  0x43   : > { %p741_p0 = scmp.ne.s32.totalorder %s982_s6, %s740_s23  ;;  %s745_s4 = sshll.u32 %s846_s28, 4  ;;  %s746_s4 = int_to_ptr.vmem [resolvable:$false] %s745_s4 }
  0x44   : > { %s747_s5 = scalar_lea.vmem %s746_s4, 4096  ;;  %p748_p6 = scmp.lt.s32.totalorder %s982_s6, %s746_s4 }
  0x45   : > { %p743_p5 = pnand %p741_p0, %p727_p10  ;;  %p749_p12 = scmp.lt.s32.totalorder %s747_s5, %s740_s23 }
  0x47   : > { %p744_p3 = pneg %p743_p5  ;;  %p750_p2 = por %p749_p12, %p748_p6 }
  0x49   : > { %p751_p7 = pnand %p750_p2, %p744_p3 }
  0x4b   : > { %754 = shalt.err (!%p751_p7)
}
  0x4c   : > { %s847_s24 = smov 1536   ;;  %s848_s15 = smov 512  }
  0x4d   : > { %s849_s16 = smov 32   ;;  %p1118_p10 = scmp.ne.s32.totalorder %s1114_s22, 0 }
  0x4e   : > { %630 = dma.hbm_to_vmem [thread:$0]  (!%p1117_p8), %s977_s25, 2048, %s982_s6, %s984_s8, %s847_s24, %s848_s15, %s849_s16  }
  0x4f   : > { %183 = sbr.rel (%p1118_p10) target bundleno = 337 (0x151), region = 28  ;;  %p1119_p1 = scmp.ne.s32.totalorder (!%p1118_p10), %s1109_s17, 0 }
  0x56   : > { %808 = dma.done.wait (%p1119_p1), [#allocation4], 256  }
  0x57   : > { %810 = vsyncadd (%p1119_p1), [#allocation4], 4294967040  ;;  %s1019_s18 = sand.u32 1, %s825_s10   ;;  %p1120_p8 = scmp.ne.s32.totalorder %s1111_s19, 0 }
  0x58   : > { %s586_s30 = sshll.u32 %s1019_s18, 7  ;;  %s190_s29 = scalar_lea.sflag [#allocation7], %s1019_s18 }
  0x59   : > { %s1023_s3 = scalar_lea.vmem [#allocation6], %s586_s30 }
  0x5a   : > { %812 = dma.done.wait (%p1120_p8), %s190_s29, 2048  }
  0x5b   : > { %814 = vsyncadd (%p1120_p8), %s190_s29, 4294965248  ;;  %v850_v0 = vmov 0.0   ;;  %v242_v1 = vld [vmem:[%s1023_s3 + $0x8] sm:$0xff]  ;;  %v244_v3 = vld [vmem:[%s1023_s3 + $0x18] sm:$0xff]  ;;  %vm257_vm0 = vcmask 261120   ;;  %s587_s17 = sshll.u32 %s1019_s18, 6 }
  0x5c   : > { %328 = vmatprep.mubr.f32.mxu0 %v850_v0  ;;  %405 = vmatprep.mubr.f32.mxu1 %v850_v0  ;;  %v246_v2 = vld [vmem:[%s1023_s3 + $0x28] sm:$0xff]  ;;  %v248_v5 = vld [vmem:[%s1023_s3 + $0x38] sm:$0xff]  ;;  %v241_v6 = vld [vmem:[%s1023_s3] sm:$0xff]  ;;  %s213_s19 = scalar_lea.vmem [#allocation8], %s587_s17  ;;  %s598_s26 = sshll.u32 %s833_s12, 9 }
  0x5d   : > { %v599_v4 = vpack.c.bf16 %v246_v2, %v242_v1  ;;  %v245_v7 = vld [vmem:[%s1023_s3 + $0x20] sm:$0xff]  ;;  %v607_v8 = vpack.c.bf16 %v248_v5, %v244_v3  ;;  %v243_v10 = vld [vmem:[%s1023_s3 + $0x10] sm:$0xff]  ;;  %v250_v12 = vld [vmem:[%s1023_s3 + $0x48] sm:$0xff]  ;;  %s470_s22 = sshll.u32 %s213_s19, 4  ;;  %s1052_s8 = scalar_lea.hbm %s1102_s2, %s598_s26  ;;  %s1047_s22 = int_to_ptr.vmem [resolvable:$true] %s470_s22 }
  0x5e   : > { %v601_v9 = vpack.c.bf16 %v245_v7, %v241_v6  ;;  %v247_v11 = vld [vmem:[%s1023_s3 + $0x30] sm:$0xff]  ;;  %v254_v14 = vld [vmem:[%s1023_s3 + $0x68] sm:$0xff]  ;;  %v252_v15 = vld [vmem:[%s1023_s3 + $0x58] sm:$0xff]  ;;  %s454_s12 = scalar_lea.sflag [#allocation5], %s1019_s18  ;;  %s755_s23 = scalar_lea.vmem %s1047_s22, 1024 }
  0x5f   : > { %600 = vmatprep.subr.bf16.mxu0 %v599_v4  ;;  %v609_v13 = vpack.c.bf16 %v247_v11, %v243_v10  ;;  %v256_v16 = vld [vmem:[%s1023_s3 + $0x78] sm:$0xff]  ;;  %608 = vmatprep.subr.bf16.mxu1 %v607_v8  ;;  %v603_v17 = vpack.c.bf16 %v254_v14, %v250_v12  ;;  %v249_v19 = vld [vmem:[%s1023_s3 + $0x40] sm:$0xff]  ;;  %v251_v21 = vld [vmem:[%s1023_s3 + $0x50] sm:$0xff]  ;;  %p756_p9 = scmp.ne.s32.totalorder %s1047_s22, %s755_s23  ;;  %p1121_p11 = scmp.ne.s32.totalorder %s1112_s20, 0 }
  0x60   : > { %602 = vmatpush1.bf16.msra.mxu0 %v601_v9  ;;  %v611_v18 = vpack.c.bf16 %v256_v16, %v252_v15  ;;  %v253_v20 = vld [vmem:[%s1023_s3 + $0x60] sm:$0xff]  ;;  %v255_v23 = vld [vmem:[%s1023_s3 + $0x70] sm:$0xff]  ;;  %v240_v26 = vld [vmem:[#allocation3 + $0x8] sm:$0xff]  ;;  %s851_s28 = smov [#allocation8]  }
  0x61   : > { %610 = vmatpush1.bf16.msra.mxu1 %v609_v13  ;;  %v605_v22 = vpack.c.bf16 %v253_v20, %v249_v19  ;;  %604 = vmatprep.subr.bf16.mxu0 %v603_v17  ;;  %v613_v24 = vpack.c.bf16 %v255_v23, %v251_v21  ;;  %v239_v25 = vld [vmem:[#allocation3] sm:$0xff]  ;;  %p757_p4 = pnand %p756_p9, %p1121_p11  ;;  %s759_s4 = sshll.u32 %s851_s28, 4  ;;  %s760_s4 = int_to_ptr.vmem [resolvable:$false] %s759_s4 }
  0x62   : > { %612 = vmatprep.subr.bf16.mxu1 %v611_v18  ;;  %s761_s5 = scalar_lea.vmem %s760_s4, 2048  ;;  %p762_p0 = scmp.lt.s32.totalorder %s1047_s22, %s760_s4 }
  0x63   : > { %p758_p13 = pneg %p757_p4  ;;  %p763_p5 = scmp.lt.s32.totalorder %s761_s5, %s755_s23 }
  0x64   : > { %606 = vmatpush1.bf16.msra.mxu0 %v605_v22 }
  0x65   : > { %614 = vmatpush1.bf16.msra.mxu1 %v613_v24  ;;  %p764_p3 = por %p763_p5, %p762_p0 }
  0x67   : > { %588 = vmatmul.mubr.msk.f32.vlgmr.msra.gmra.mrb[0].mxu0 %vm257_vm0, %v239_v25  ;;  %p765_p6 = pnand %p764_p3, %p758_p13 }
  0x68   : > { %590 = vmatmul.mubr.msk.f32.vlgmr.msra.gmra.mrb[0].mxu1 %vm257_vm0, %v239_v25  ;;  %334 = vmatprep.mubr.f32.mxu0 %v850_v0 }
  0x69   : > { %411 = vmatprep.mubr.f32.mxu1 %v850_v0 }
  0x6b   : > { %589 = vmatmul.mubr.msk.f32.gmra.mrb[2].mxu0 %vm257_vm0, %v240_v26 }
  0x6c   : > { %591 = vmatmul.mubr.msk.f32.gmra.mrb[2].mxu1 %vm257_vm0, %v240_v26 }
 0x13a   : > { %v330_v27 = vpop.f32.mrb[0].mxu0 }
 0x13b   : > { %445 = vst [vmem:[%s213_s19] sm:$0xff] %v330_v27  ;;  %v407_v28 = vpop.f32.mrb[0].mxu1  ;;  %v332_v29 = vpop.f32.mrb[1].mxu0 }
 0x13c   : > { %447 = vst [vmem:[%s213_s19 + $0x10] sm:$0xff] %v407_v28  ;;  %446 = vst [vmem:[%s213_s19 + $0x8] sm:$0xff] %v332_v29  ;;  %v409_v30 = vpop.f32.mrb[1].mxu1 }
 0x13d   : > { %448 = vst [vmem:[%s213_s19 + $0x18] sm:$0xff] %v409_v30 }
 0x13e   : > { %v336_v31 = vpop.f32.mrb[2].mxu0 }
 0x13f   : > { %449 = vst [vmem:[%s213_s19 + $0x20] sm:$0xff] %v336_v31  ;;  %v413_v32 = vpop.f32.mrb[2].mxu1  ;;  %v338_v33 = vpop.f32.mrb[3].mxu0 }
 0x140   : > { %451 = vst [vmem:[%s213_s19 + $0x30] sm:$0xff] %v413_v32  ;;  %450 = vst [vmem:[%s213_s19 + $0x28] sm:$0xff] %v338_v33  ;;  %v415_v34 = vpop.f32.mrb[3].mxu1 }
 0x141   : > { %452 = vst [vmem:[%s213_s19 + $0x38] sm:$0xff] %v415_v34 }
 0x142   : > { %768 = shalt.err (!%p765_p6)
}
 0x143   : > { %s769_s24 = scalar_lea.hbm %s1052_s8, 1024  ;;  %s773_s30 = scalar_lea.hbm %s1102_s2, 3072 }
 0x144   : > { %p770_p12 = scmp.ne.s32.totalorder %s1052_s8, %s769_s24  ;;  %p774_p10 = scmp.lt.u32.totalorder %s1052_s8, %s1102_s2 }
 0x145   : > { %p775_p1 = scmp.lt.u32.totalorder %s773_s30, %s769_s24  ;;  %p777_p9 = scmp.lt.u32.totalorder %s769_s24, %s1052_s8 }
 0x146   : > { %p771_p2 = pnand %p770_p12, %p1121_p11 }
 0x147   : > { %p776_p8 = por %p775_p1, %p774_p10 }
 0x148   : > { %p772_p7 = pneg %p771_p2 }
 0x149   : > { %p778_p4 = por %p777_p9, %p776_p8 }
 0x14b   : > { %p779_p13 = pnand %p778_p4, %p772_p7 }
 0x14d   : > { %782 = shalt.err (!%p779_p13)
}
 0x14e   : > { %s852_s17 = smov 512   ;;  %s853_s19 = smov 1536  }
 0x14f   : > { %s854_s26 = smov 32  }
 0x150   : > { %621 = dma.vmem_to_hbm [thread:$0]  (%p1121_p11), %s1047_s22, 1024, %s1052_s8, %s454_s12, %s852_s17, %s853_s19, %s854_s26  }
 0x151 PF: > { %p638_p0 = scmp.ge.s32.totalorder %s841_s14, 2  ;;  %s485_s25 = sand.u32 1, %s821_s9  }
 0x152   : > { %p1122_p5 = scmp.ne.s32.totalorder %s1113_s21, 0  ;;  %s486_s6 = scalar_lea.sflag [#allocation5], %s485_s25 }
 0x154   : > { %p632_p3 = pnand %p638_p0, %p1122_p5 }
 0x156   : > { %816 = dma.done.wait (!%p632_p3), %s486_s6, 1024  }
 0x157   : > { %818 = vsyncadd (!%p632_p3), %s486_s6, 4294966272  ;;  %s19_s14 = sadd.s32 1, %s841_s14   ;;  %s1123_s9 = smov %s825_s10 }
 0x158   : > { %p16_p6 = scmp.ge.s32.totalorder %s19_s14, 5   ;;  %s1124_s10 = smov %s829_s11 }
 0x159   : > { %s1125_s11 = smov %s980_s7  ;;  %s1126_s12 = smov %s837_s13 }
 0x15a   : > { %s1127_s13 = smov %s1129_s27  ;;  %18 = sbr.rel (!%p16_p6) target bundleno = 7 (0x7), region = 87 }
 0x161   :  { %491 = vsyncpa [#allocation4], 1 }
 0x162   :  { %493 = vsyncpa [#allocation4 + $0x1], 1 }
 0x163   :  { %494 = vsyncpa [#allocation7], 1 }
 0x164   :  { %496 = vsyncpa [#allocation7 + $0x1], 1 }
 0x165   :  { %497 = vsyncpa [#allocation5], 1 }
 0x166   :  { %499 = vsyncpa [#allocation5 + $0x1], 1 }

</bundles_post_ra>
